<compile_context>
chip_gen: v7x
topology: tpu7x:2x2x1
jax: 0.10.0
libtpu: 0.0.40
codegen_flags: <defaults>
</compile_context>

<pallas_src>
import functools
import math

import jax
import jax.numpy as jnp
from jax import lax
from jax.experimental import pallas as pl
from jax.experimental.pallas import tpu as pltpu

_MASK_VALUE = -1e9


def _round_up(x, m):
    return (x + m - 1) // m * m


def _tpu_budget():
    """Returns (max query tile, per-core VMEM capacity bytes)."""
    cap = 128 * 1024 * 1024
    max_tq = 256
    try:
        info = pltpu.get_tpu_info()
        cap = int(info.vmem_capacity_bytes)
        gen = str(getattr(info, "chip_version", ""))
    except Exception:
        return max_tq, cap
    # v7x (64 MiB VMEM) and v5-family (MXU M=128) both prefer tq=128.
    if cap <= 64 * 1024 * 1024 or "5" in gen:
        max_tq = 128
    return max_tq, cap


def _const_spec(shape):
    """BlockSpec for a grid-invariant input: single-buffered when supported."""
    idx = lambda b, q: (0,) * len(shape)
    if hasattr(pl, "Buffered"):
        try:
            return pl.BlockSpec(shape, idx, pipeline_mode=pl.Buffered(1))
        except TypeError:
            pass
    return pl.BlockSpec(shape, idx)


# ---------------------------------------------------------------------------
# K/V projection kernel (hoisted out of the attention kernel)
# ---------------------------------------------------------------------------
def _kv_proj_kernel(x_ref, wkT_ref, wvT_ref, xk_ref, xv_ref):
    xt = x_ref[0]                                             # (tq, dim)
    xk_ref[0] = jnp.dot(xt, wkT_ref[...],
                        preferred_element_type=jnp.float32).astype(xk_ref.dtype)
    xv_ref[0] = jnp.dot(xt, wvT_ref[...],
                        preferred_element_type=jnp.float32).astype(xv_ref.dtype)


def _project_kv(xp, wkT, wvT, tq):
    bs, slen_p, dim = xp.shape
    n_q = slen_p // tq
    return pl.pallas_call(
        _kv_proj_kernel,
        out_shape=(jax.ShapeDtypeStruct((bs, slen_p, dim), xp.dtype),
                   jax.ShapeDtypeStruct((bs, slen_p, dim), xp.dtype)),
        grid=(bs, n_q),
        in_specs=[
            pl.BlockSpec((1, tq, dim), lambda b, q: (b, q, 0)),
            _const_spec((dim, dim)),                          # wk^T (scaled)
            _const_spec((dim, dim)),                          # wv^T
        ],
        out_specs=(
            pl.BlockSpec((1, tq, dim), lambda b, q: (b, q, 0)),
            pl.BlockSpec((1, tq, dim), lambda b, q: (b, q, 0)),
        ),
        compiler_params=pltpu.CompilerParams(
            dimension_semantics=("parallel", "parallel")),
    )(xp, wkT, wvT)


# ---------------------------------------------------------------------------
# Attention kernel
# ---------------------------------------------------------------------------
def _attention_kernel(*refs, causal, mask_value, approx_recip):
    if causal:
        x_ref, xk_ref, xv_ref, woT_ref, out_ref, scores_ref, pre_ref = refs
        mask_ref = None
    else:
        x_ref, xk_ref, xv_ref, woT_ref, mask_ref, out_ref, scores_ref, pre_ref = refs

    tq, slen_p = scores_ref.shape[2], scores_ref.shape[3]
    q_idx = pl.program_id(1)

    # scores = q @ k^T (1/sqrt(dim) already folded into wk^T).
    # Contract the last dims — no transpose materialized on the XLU.
    s = lax.dot_general(x_ref[0], xk_ref[0], (((1,), (1,)), ((), ())),
                        preferred_element_type=jnp.float32)   # (tq, slen_p)

    if causal:
        # Build the additive causal mask in-registers (no HBM mask stream).
        rows = q_idx * tq + lax.broadcasted_iota(jnp.int32, (tq, slen_p), 0)
        cols = lax.broadcasted_iota(jnp.int32, (tq, slen_p), 1)
        s = s + jnp.where(cols > rows,
                          jnp.float32(mask_value), jnp.float32(0.0))
    else:
        s = s + mask_ref[...].astype(jnp.float32)

    pre_ref[0, 0] = s.astype(pre_ref.dtype)

    # Numerically stable softmax in fp32.
    m = jnp.max(s, axis=-1, keepdims=True)
    e = jnp.exp(s - m)
    l = jnp.sum(e, axis=-1, keepdims=True)
    p = e * pl.reciprocal(l, approx=approx_recip)
    p_cast = p.astype(scores_ref.dtype)
    scores_ref[0, 0] = p_cast

    # output = (p @ v) @ wo^T
    o = jnp.dot(p_cast.astype(xv_ref.dtype), xv_ref[0],
                preferred_element_type=jnp.float32)            # (tq, dim)
    out_ref[0] = jnp.dot(o.astype(woT_ref.dtype), woT_ref[...],
                         preferred_element_type=jnp.float32).astype(out_ref.dtype)


def attention_forward(x, wk, wv, wo, mask=None, *, no_sqrtd=False,
                      causal=False, mask_value=_MASK_VALUE):
    """Attention.forward (n_heads=1, wq=Identity, no RoPE / low-rank).

    If `causal=True` the additive causal mask (0 / mask_value) is generated
    inside the kernel and `mask` is ignored; otherwise `mask` (slen, slen)
    is streamed as an input.
    """
    if not causal and mask is None:
        raise ValueError("mask is required unless causal=True")
    bs, slen, dim = x.shape

    max_tq, vmem_cap = _tpu_budget()
    if slen <= max_tq:
        slen_p = _round_up(slen, 8)
        tq = slen_p
    else:
        tq = max_tq
        slen_p = _round_up(slen, tq)
    n_q = slen_p // tq
    pad = slen_p - slen

    # Fold 1/sqrt(dim) into wk (fp32, before any cast); pre-transpose weights.
    scale = 1.0 if no_sqrtd else 1.0 / math.sqrt(dim)
    wkT = (wk.astype(jnp.float32) * jnp.float32(scale)).T.astype(x.dtype)
    wvT = wv.T.astype(x.dtype)
    woT = wo.T.astype(x.dtype)

    xp = x if pad == 0 else jnp.pad(x, ((0, 0), (0, pad), (0, 0)))
    if not causal:
        maskp = mask if pad == 0 else jnp.pad(
            mask, ((0, pad), (0, pad)), constant_values=mask_value)

    # K/V projections (small separate pallas_call) so the attention grid has
    # no carried scratch and both axes can be "parallel".
    xk, xv = _project_kv(xp, wkT, wvT, tq)

    # Per-step VMEM accounting -> vmem_limit_bytes (capped below physical).
    itemsize = jnp.dtype(x.dtype).itemsize
    mask_itemsize = 0 if causal else jnp.dtype(maskp.dtype).itemsize
    budget = (
        2 * tq * dim * itemsize             # x block (double-buffered)
        + 2 * 2 * slen_p * dim * itemsize   # xk + xv blocks
        + 2 * dim * dim * itemsize          # wo^T
        + 2 * 2 * tq * slen_p * itemsize    # scores + pre output blocks
        + 2 * tq * dim * itemsize           # out block
        + 2 * tq * slen_p * mask_itemsize   # mask block (non-causal only)
        + 6 * tq * slen_p * 4               # fp32 softmax temporaries
        + (2 << 20))
    vmem_limit = int(min(vmem_cap - vmem_cap // 4, max(budget, 32 << 20)))

    kernel = functools.partial(
        _attention_kernel, causal=causal, mask_value=float(mask_value),
        approx_recip=bool(x.dtype == jnp.bfloat16))

    in_specs = [
        pl.BlockSpec((1, tq, dim), lambda b, q: (b, q, 0)),       # queries
        pl.BlockSpec((1, slen_p, dim), lambda b, q: (b, 0, 0)),   # xk
        pl.BlockSpec((1, slen_p, dim), lambda b, q: (b, 0, 0)),   # xv
        _const_spec((dim, dim)),                                  # wo^T
    ]
    operands = [xp, xk, xv, woT]
    if not causal:
        in_specs.append(pl.BlockSpec((tq, slen_p), lambda b, q: (q, 0)))
        operands.append(maskp)

    out_shapes = (
        jax.ShapeDtypeStruct((bs, slen_p, dim), x.dtype),
        jax.ShapeDtypeStruct((bs, 1, slen_p, slen_p), x.dtype),
        jax.ShapeDtypeStruct((bs, 1, slen_p, slen_p), x.dtype),
    )
    out, scores, pre = pl.pallas_call(
        kernel,
        out_shape=out_shapes,
        grid=(bs, n_q),
        in_specs=in_specs,
        out_specs=(
            pl.BlockSpec((1, tq, dim), lambda b, q: (b, q, 0)),
            pl.BlockSpec((1, 1, tq, slen_p), lambda b, q: (b, 0, q, 0)),
            pl.BlockSpec((1, 1, tq, slen_p), lambda b, q: (b, 0, q, 0)),
        ),
        compiler_params=pltpu.CompilerParams(
            dimension_semantics=("parallel", "parallel"),
            vmem_limit_bytes=vmem_limit),
    )(*operands)

    if pad:
        out = out[:, :slen]
        scores = scores[:, :, :slen, :slen]
        pre = pre[:, :, :slen, :slen]
    return out, scores, pre


# ---------------------------------------------------------------------------
# Pure-JAX reference + test
# ---------------------------------------------------------------------------
def _reference(x, mask, wk, wv, wo, *, no_sqrtd=False):
    hp = lax.Precision.HIGHEST
    xk = jnp.einsum("bsd,ed->bse", x, wk, precision=hp)
    xv = jnp.einsum("bsd,ed->bse", x, wv, precision=hp)
    s = jnp.einsum("bqd,bkd->bqk", x, xk, precision=hp)
    if not no_sqrtd:
        s = s / math.sqrt(x.shape[-1])
    s = s + mask[None]
    pre = s[:, None].astype(x.dtype)                         # (bs,1,slen,slen)
    p = jax.nn.softmax(s[:, None].astype(jnp.float32), axis=-1).astype(x.dtype)
    out = jnp.einsum("bhqk,bkd->bhqd", p, xv, precision=hp)[:, 0]
    out = jnp.einsum("bsd,ed->bse", out, wo, precision=hp)
    return out, p, pre


if __name__ == "__main__":
    bs, slen, dim = 2, 8, 32
    key = jax.random.PRNGKey(0)
    kx, kk, kv, ko = jax.random.split(key, 4)

    bound = 1.0 / math.sqrt(dim)
    x = jax.random.normal(kx, (bs, slen, dim), dtype=jnp.float32)
    wk = jax.random.uniform(kk, (dim, dim), jnp.float32, -bound, bound)
    wv = jax.random.uniform(kv, (dim, dim), jnp.float32, -bound, bound)
    wo = jax.random.uniform(ko, (dim, dim), jnp.float32, -bound, bound)

    mask = jnp.where(jnp.arange(slen)[:, None] >= jnp.arange(slen)[None, :],
                     0.0, _MASK_VALUE).astype(jnp.float32)

    # Causal path: mask generated in-kernel (no HBM mask stream).
    out, scores, pre = attention_forward(x, wk, wv, wo, causal=True)
    # Explicit-mask path: arbitrary additive masks still supported.
    out_m, scores_m, pre_m = attention_forward(x, wk, wv, wo, mask=mask)
    jax.block_until_ready((out, scores, pre, out_m, scores_m, pre_m))

    ref_out, ref_scores, ref_pre = _reference(x, mask, wk, wv, wo)

    checks = (
        (out, ref_out, 2e-5), (scores, ref_scores, 2e-5), (pre, ref_pre, 1e-4),
        (out_m, ref_out, 2e-5), (scores_m, ref_scores, 2e-5), (pre_m, ref_pre, 1e-4),
    )
    for got, want, atol in checks:
        assert jnp.allclose(got, want, atol=atol, rtol=1e-5), \
            float(jnp.max(jnp.abs(got - want)))

    print("KERNEL_OK")
</pallas_src>

<mosaic_0001>
module attributes {stable_mosaic.version = 11 : i64} {
  func.func @_kv_proj_kernel(%arg0: i32, %arg1: i32, %arg2: memref<1x8x32xf32, #tpu.memory_space<vmem>>, %arg3: memref<32x32xf32, #tpu.memory_space<vmem>>, %arg4: memref<32x32xf32, #tpu.memory_space<vmem>>, %arg5: memref<1x8x32xf32, #tpu.memory_space<vmem>>, %arg6: memref<1x8x32xf32, #tpu.memory_space<vmem>>) attributes {dimension_semantics = [#tpu.dimension_semantics<parallel>, #tpu.dimension_semantics<parallel>], iteration_bounds = array<i64: 2, 1>, scalar_prefetch = 0 : i64, scratch_operands = 0 : i64, tpu.core_type = #tpu.core_type<tc>, window_params = [{transform_indices = @transform_0, window_bounds = array<i64: 1, 8, 32>}, {pipeline_mode = #tpu.pipeline_mode<synchronous>, transform_indices = @transform_1, window_bounds = array<i64: 32, 32>}, {pipeline_mode = #tpu.pipeline_mode<synchronous>, transform_indices = @transform_2, window_bounds = array<i64: 32, 32>}, {transform_indices = @transform_3, window_bounds = array<i64: 1, 8, 32>}, {transform_indices = @transform_4, window_bounds = array<i64: 1, 8, 32>}]} {
    %c0 = arith.constant 0 : index
    %c0_0 = arith.constant 0 : index
    %c0_1 = arith.constant 0 : index
    %0 = vector.load %arg2[%c0, %c0_0, %c0_1] : memref<1x8x32xf32, #tpu.memory_space<vmem>>, vector<1x8x32xf32>
    %1 = vector.shape_cast %0 : vector<1x8x32xf32> to vector<8x32xf32>
    %c0_2 = arith.constant 0 : index
    %c0_3 = arith.constant 0 : index
    %2 = vector.load %arg3[%c0_2, %c0_3] : memref<32x32xf32, #tpu.memory_space<vmem>>, vector<32x32xf32>
    %cst = arith.constant dense<0.000000e+00> : vector<8x32xf32>
    %3 = tpu.matmul %1, %2, %cst {dimension_numbers = #tpu.dot_dimension_numbers<[1], [0], [0], [1], [0, 0, 1, 1], [], []>} : vector<8x32xf32>, vector<32x32xf32>, vector<8x32xf32> -> vector<8x32xf32>
    %c0_4 = arith.constant 0 : index
    %c0_5 = arith.constant 0 : index
    %c0_6 = arith.constant 0 : index
    %4 = vector.load %arg5[%c0_4, %c0_5, %c0_6] : memref<1x8x32xf32, #tpu.memory_space<vmem>>, vector<1x8x32xf32>
    %5 = vector.shape_cast %4 : vector<1x8x32xf32> to vector<8x32xf32>
    %6 = vector.shape_cast %3 : vector<8x32xf32> to vector<1x8x32xf32>
    tpu.vector_store %arg5[%c0_4, %c0_5, %c0_6], %6 {strides = array<i32>} : memref<1x8x32xf32, #tpu.memory_space<vmem>>, vector<1x8x32xf32>,
    %c0_7 = arith.constant 0 : index
    %c0_8 = arith.constant 0 : index
    %7 = vector.load %arg4[%c0_7, %c0_8] : memref<32x32xf32, #tpu.memory_space<vmem>>, vector<32x32xf32>
    %cst_9 = arith.constant dense<0.000000e+00> : vector<8x32xf32>
    %8 = tpu.matmul %1, %7, %cst_9 {dimension_numbers = #tpu.dot_dimension_numbers<[1], [0], [0], [1], [0, 0, 1, 1], [], []>} : vector<8x32xf32>, vector<32x32xf32>, vector<8x32xf32> -> vector<8x32xf32>
    %c0_10 = arith.constant 0 : index
    %c0_11 = arith.constant 0 : index
    %c0_12 = arith.constant 0 : index
    %9 = vector.load %arg6[%c0_10, %c0_11, %c0_12] : memref<1x8x32xf32, #tpu.memory_space<vmem>>, vector<1x8x32xf32>
    %10 = vector.shape_cast %9 : vector<1x8x32xf32> to vector<8x32xf32>
    %11 = vector.shape_cast %8 : vector<8x32xf32> to vector<1x8x32xf32>
    tpu.vector_store %arg6[%c0_10, %c0_11, %c0_12], %11 {strides = array<i32>} : memref<1x8x32xf32, #tpu.memory_space<vmem>>, vector<1x8x32xf32>,
    return
  }
  func.func @transform_0(%arg0: i32, %arg1: i32) -> (i32, i32, i32) {
    %c0_i32 = arith.constant 0 : i32
    %c0_i32_0 = arith.constant 0 : i32
    return %arg0, %arg1, %c0_i32 : i32, i32, i32
  }
  func.func @transform_1(%arg0: i32, %arg1: i32) -> (i32, i32) {
    %c0_i32 = arith.constant 0 : i32
    %c0_i32_0 = arith.constant 0 : i32
    %c0_i32_1 = arith.constant 0 : i32
    return %c0_i32, %c0_i32_0 : i32, i32
  }
  func.func @transform_2(%arg0: i32, %arg1: i32) -> (i32, i32) {
    %c0_i32 = arith.constant 0 : i32
    %c0_i32_0 = arith.constant 0 : i32
    %c0_i32_1 = arith.constant 0 : i32
    return %c0_i32, %c0_i32_0 : i32, i32
  }
  func.func @transform_3(%arg0: i32, %arg1: i32) -> (i32, i32, i32) {
    %c0_i32 = arith.constant 0 : i32
    %c0_i32_0 = arith.constant 0 : i32
    return %arg0, %arg1, %c0_i32 : i32, i32, i32
  }
  func.func @transform_4(%arg0: i32, %arg1: i32) -> (i32, i32, i32) {
    %c0_i32 = arith.constant 0 : i32
    %c0_i32_0 = arith.constant 0 : i32
    return %arg0, %arg1, %c0_i32 : i32, i32, i32
  }
}

</mosaic_0001>

<bundles_post_ra>
// kernel: tpu_custom_call.1
= control target key start
LH: loop header
LB: loop body
LE: loop exit
PB: predicated region body
PF: predicated region fallthrough
CT: control target
= control target key end

     0   :  { %10 = vsyncpa [#allocation3], 0  ;;  %s1281_s0 = inlined_call_operand.hbm [shape: f32[2,8,32], index: 0, kind: input, shape index: {}]   ;;  %s1282_s1 = inlined_call_operand.hbm [shape: f32[32,32], index: 1, kind: input, shape index: {}]   ;;  %s1283_s2 = inlined_call_operand.hbm [shape: f32[32,32], index: 2, kind: input, shape index: {}]   ;;  %s1284_s3 = inlined_call_operand.hbm [shape: f32[2,8,32], index: 3, kind: output, shape index: {0}]   ;;  %s1285_s4 = inlined_call_operand.hbm [shape: f32[2,8,32], index: 4, kind: output, shape index: {1}]  }
   0x1   :  { %12 = vsyncpa [#allocation3 + $0x1], 0 }
   0x2   :  { %13 = vsyncpa [#allocation6], 0 }
   0x3   :  { %14 = vsyncpa [#allocation4], 0 }
   0x4   :  { %16 = vsyncpa [#allocation4 + $0x1], 0 }
   0x5   :  { %17 = vsyncpa [#allocation10], 0 }
   0x6   :  { %19 = vsyncpa [#allocation10 + $0x1], 0  ;;  %s993_s15 = smov 0   ;;  %s995_s16 = smov 0  }
   0x7   :  { %s997_s17 = smov 0   ;;  %s999_s18 = smov 0  }
   0x8   :  { %s1001_s19 = smov 0   ;;  %s1003_s20 = smov 0  }
   0x9 LB: > { %s593_s21 = sadd.s32 4294967295, %s956_s20   ;;  %s594_s22 = sadd.s32 4294967294, %s956_s20   ;;  %s956_s20 = sphi %s1003_s20, %s25_s20   ;;  %s952_s19 = sphi %s1001_s19, %s1307_s19   ;;  %s948_s18 = sphi %s999_s18, %s1306_s18   ;;  %s944_s17 = sphi %s997_s17, %s1305_s17   ;;  %s940_s16 = sphi %s995_s16, %s1304_s16   ;;  %s936_s15 = sphi %s993_s15, %s1303_s15  }
   0xa   : > { %p59_p0 = scmp.ne.s32.totalorder %s940_s16, %s936_s15  ;;  %p1027_p1 = scmp.eq.s32.totalorder %s593_s21, 0 }
   0xb   : > { %p1031_p2 = scmp.eq.s32.totalorder %s593_s21, 1  ;;  %p133_p3 = scmp.eq.s32.totalorder %s594_s22, 1 }
   0xc   : > { %s1290_s23 = scalar_select %p1027_p1, 1, 0 }
   0xd   : > { %p1037_p4 = por %p1027_p1, %p59_p0  ;;  %p595_p5 = scmp.ge.s32.totalorder %s956_s20, 1 }
   0xe   : > { %p1042_p6 = por %p133_p3, %p59_p0  ;;  %p168_p7 = scmp.lt.s32.totalorder %s956_s20, 3 }
   0xf   : > { %s1292_s25 = scalar_select %p1037_p4, 1, 0 }
  0x10   : > { %s1293_s26 = scalar_select %p1042_p6, 1, 0 }
  0x11   : > { %p1047_p8 = pnand %p595_p5, %p168_p7  ;;  %s958_s28 = smov [#allocation5]  }
  0x12   : > { %s180_s29 = sshll.u32 %s958_s28, 4  ;;  %s959_s5 = smov [#allocation7]   ;;  %s1051_s29 = int_to_ptr.vmem [resolvable:$true] %s180_s29 }
  0x13   : > { %p673_p9 = pneg %p1047_p8  ;;  %s193_s6 = sshll.u32 %s959_s5, 4  ;;  %s1062_s6 = int_to_ptr.vmem [resolvable:$true] %s193_s6 }
  0x14   : > { %s752_s9 = scalar_lea.hbm %s1282_s1, 512 }
  0x15   : > { %p1058_p11 = pnand %p673_p9, %p1027_p1  ;;  %p753_p12 = scmp.ne.s32.totalorder %s1282_s1, %s752_s9 }
  0x16   : > { %p759_p5 = scmp.lt.u32.totalorder %s752_s9, %s1282_s1 }
  0x17   : > { %p754_p13 = pneg %p1058_p11 }
  0x19   : > { %p755_p0 = pnand %p754_p13, %p753_p12 }
  0x1b   : > { %p756_p3 = pneg %p755_p0 }
  0x1d   : > { %p761_p7 = pnand %p759_p5, %p756_p3 }
  0x1f   : > { %764 = shalt.err (!%p761_p7)
}
  0x20   : > { %s765_s14 = scalar_lea.vmem %s1051_s29, 512  ;;  %p773_p1 = scmp.lt.s32.totalorder %s1051_s29, %s1051_s29 }
  0x21   : > { %p766_p9 = scmp.ne.s32.totalorder %s1051_s29, %s765_s14  ;;  %p774_p12 = scmp.lt.s32.totalorder %s765_s14, %s765_s14 }
  0x23   : > { %p768_p10 = pnand %p766_p9, %p754_p13  ;;  %p775_p0 = por %p774_p12, %p773_p1 }
  0x25   : > { %p769_p6 = pneg %p768_p10 }
  0x27   : > { %p776_p4 = pnand %p775_p0, %p769_p6 }
  0x29   : > { %779 = shalt.err (!%p776_p4)
}
  0x2a   : > { %s960_s21 = smov 128   ;;  %s961_s22 = smov 8  }
  0x2b   : > { %676 = dma.hbm_to_vmem [thread:$0]  (!%p1058_p11), %s1282_s1, 512, %s1051_s29, [#allocation6], %s960_s21, %s960_s21, %s961_s22  }
  0x2c   : > { %s780_s9 = scalar_lea.hbm %s1283_s2, 512 }
  0x2d   : > { %p781_p1 = scmp.ne.s32.totalorder %s1283_s2, %s780_s9  ;;  %p787_p10 = scmp.lt.u32.totalorder %s780_s9, %s1283_s2 }
  0x2f   : > { %p783_p4 = pnand %p781_p1, %p754_p13 }
  0x31   : > { %p784_p6 = pneg %p783_p4 }
  0x33   : > { %p789_p3 = pnand %p787_p10, %p784_p6 }
  0x35   : > { %792 = shalt.err (!%p789_p3)
}
  0x36   : > { %s793_s29 = scalar_lea.vmem %s1062_s6, 512  ;;  %p801_p12 = scmp.lt.s32.totalorder %s1062_s6, %s1062_s6 }
  0x37   : > { %p794_p5 = scmp.ne.s32.totalorder %s1062_s6, %s793_s29  ;;  %p802_p0 = scmp.lt.s32.totalorder %s793_s29, %s793_s29 }
  0x39   : > { %p796_p7 = pnand %p794_p5, %p754_p13  ;;  %p803_p1 = por %p802_p0, %p801_p12 }
  0x3b   : > { %p797_p9 = pneg %p796_p7 }
  0x3d   : > { %p804_p4 = pnand %p803_p1, %p797_p9 }
  0x3f   : > { %807 = shalt.err (!%p804_p4)
}
  0x40   : > { %679 = dma.hbm_to_vmem [thread:$0]  (!%p1058_p11), %s1283_s2, 512, %s1062_s6, [#allocation6], %s960_s21, %s960_s21, %s961_s22  }
  0x41   : > { %s37_s5 = sadd.s32 1, %s952_s19  ;;  %s46_s7 = sadd.s32 1, %s944_s17 }
  0x42   : > { %p39_p13 = scmp.ge.s32.totalorder %s37_s5, 2  ;;  %p53_p6 = scmp.ne.s32.totalorder %s944_s17, %s940_s16 }
  0x43   : > { %p54_p10 = scmp.eq.s32.totalorder %s956_s20, 0  ;;  %p693_p3 = scmp.lt.s32.totalorder %s956_s20, 2 }
  0x44   : > { %s1309_s5 = smov (%p39_p13, %s37_s5), 0  ;;  %p1126_p7 = por %p1031_p2, %p53_p6 }
  0x45   : > { %p55_p5 = por %p54_p10, %p53_p6  ;;  %s41_s8 = ssub.s32 %s952_s19, %s1309_s5 }
  0x46   : > { %s1296_s30 = scalar_select %p1126_p7, 1, 0 }
  0x47   : > { %s207_s9 = sand.u32 1, %s944_s17   ;;  %p44_p9 = scmp.eq.s32.totalorder %s41_s8, 0 }
  0x48   : > { %s599_s6 = sshll.u32 %s207_s9, 3  ;;  %s600_s21 = sshll.u32 %s952_s19, 7 }
  0x49   : > { %s1135_s22 = scalar_select %p44_p9, %s944_s17, %s46_s7  }
  0x4a   : > { %s1140_s12 = scalar_lea.hbm %s1281_s0, %s600_s21  ;;  %s211_s24 = scalar_lea.vmem [#allocation2], %s599_s6 }
  0x4b   : > { %s219_s13 = sshll.u32 %s211_s24, 4  ;;  %p1144_p2 = pnand %p693_p3, %p55_p5  ;;  %s1148_s13 = int_to_ptr.vmem [resolvable:$true] %s219_s13 }
  0x4c   : > { %s208_s14 = scalar_lea.sflag [#allocation3], %s207_s9  ;;  %s808_s28 = scalar_lea.hbm %s1140_s12, 128 }
  0x4d   : > { %p809_p11 = scmp.ne.s32.totalorder %s1140_s12, %s808_s28  ;;  %p810_p12 = pneg %p1144_p2 }
  0x4e   : > { %s813_s6 = scalar_lea.hbm %s1281_s0, 256  ;;  %p814_p4 = scmp.lt.u32.totalorder %s1140_s12, %s1281_s0 }
  0x4f   : > { %p811_p0 = pnand %p810_p12, %p809_p11  ;;  %p815_p13 = scmp.lt.u32.totalorder %s813_s6, %s808_s28 }
  0x50   : > { %p817_p10 = scmp.lt.u32.totalorder %s808_s28, %s1140_s12 }
  0x51   : > { %p812_p1 = pneg %p811_p0  ;;  %p816_p6 = por %p815_p13, %p814_p4 }
  0x53   : > { %p818_p3 = por %p817_p10, %p816_p6 }
  0x55   : > { %p819_p5 = pnand %p818_p3, %p812_p1 }
  0x57   : > { %822 = shalt.err (!%p819_p5)
}
  0x58   : > { %s823_s9 = scalar_lea.vmem %s1148_s13, 128  ;;  %s962_s11 = smov [#allocation2]  }
  0x59   : > { %p824_p9 = scmp.ne.s32.totalorder %s1148_s13, %s823_s9  ;;  %s828_s24 = sshll.u32 %s962_s11, 4  ;;  %s829_s24 = int_to_ptr.vmem [resolvable:$false] %s828_s24 }
  0x5a   : > { %s830_s7 = scalar_lea.vmem %s829_s24, 256  ;;  %p831_p7 = scmp.lt.s32.totalorder %s1148_s13, %s829_s24 }
  0x5b   : > { %p826_p11 = pnand %p824_p9, %p810_p12  ;;  %p832_p4 = scmp.lt.s32.totalorder %s830_s7, %s823_s9 }
  0x5d   : > { %p827_p0 = pneg %p826_p11  ;;  %p833_p13 = por %p832_p4, %p831_p7 }
  0x5f   : > { %p834_p6 = pnand %p833_p13, %p827_p0 }
  0x61   : > { %837 = shalt.err (!%p834_p6)
}
  0x62   : > { %683 = dma.hbm_to_vmem [thread:$0]  (!%p1144_p2), %s1140_s12, 128, %s1148_s13, %s208_s14  }
  0x63   : > { %228 = sbr.rel (%p1047_p8) target bundleno = 371 (0x173), region = 32  ;;  %s1178_s28 = sand.u32 (!%p1047_p8), 1, %s940_s16  }
  0x64   : > { %s1181_s8 = sshll.u32 (!%p1047_p8), %s1178_s28, 3  ;;  %s231_s6 = scalar_lea.sflag (!%p1047_p8), [#allocation3], %s1178_s28 }
  0x65   : > { %s234_s21 = scalar_lea.vmem (!%p1047_p8), [#allocation2], %s1181_s8  ;;  %p1298_p7 = scmp.ne.s32.totalorder (!%p1047_p8), %s1292_s25, 0 }
  0x6a   : > { %919 = dma.done.wait (%p1298_p7), %s231_s6, 128  }
  0x6b   : > { %921 = vsyncadd (%p1298_p7), %s231_s6, 4294967168  ;;  %p1299_p2 = scmp.ne.s32.totalorder %s1290_s23, 0 }
  0x6d   : > { %923 = dma.done.wait (%p1299_p2), [#allocation6], 1024  }
  0x6e   : > { %925 = vsyncadd (%p1299_p2), [#allocation6], 4294966272  ;;  %v963_v0 = vmov 0.0|0.0   ;;  %vm964_vm0 = vmmov 0   ;;  %v965_v1 = vmov 0.0   ;;  %v273_v2 = vld [vmem:[#allocation5] sm:$0xff] }
  0x6f   : > { %647 = vmatprep.subr.bf16.mxu0 %v963_v0  ;;  %653 = vmatprep.subr.bf16.mxu1 %v963_v0  ;;  %v274_v3 = vld [vmem:[#allocation5 + $0x8] sm:$0xff]  ;;  %v352_v4 = vld [vmem:[#allocation7] sm:$0xff]  ;;  %v275_v7 = vld [vmem:[#allocation5 + $0x10] sm:$0xff]  ;;  %vm277_vm1 = vcmask 261120   ;;  %s611_s23 = sshll.u32 %s948_s18, 7  ;;  %s264_s25 = scalar_lea.vmem [#allocation8], %s1181_s8 }
  0x70   : > { %633 = vmatprep.mubr.msk.f32.mxu0 %vm964_vm0, %v965_v1  ;;  %644 = vmatprep.mubr.msk.f32.mxu1 %vm964_vm0, %v965_v1  ;;  %v648_v5 = vpack.c.bf16 %v274_v3, %v273_v2  ;;  %v353_v6 = vld [vmem:[#allocation7 + $0x8] sm:$0xff]  ;;  %v276_v8 = vld [vmem:[#allocation5 + $0x18] sm:$0xff]  ;;  %v354_v10 = vld [vmem:[#allocation7 + $0x10] sm:$0xff]  ;;  %s447_s27 = sshll.u32 %s264_s25, 4  ;;  %s271_s12 = scalar_lea.vmem [#allocation9], %s1181_s8  ;;  %s1203_s27 = int_to_ptr.vmem [resolvable:$true] %s447_s27 }
  0x71   : > { %v654_v9 = vpack.c.bf16 %v353_v6, %v352_v4  ;;  %v355_v11 = vld [vmem:[#allocation7 + $0x18] sm:$0xff]  ;;  %v651_v12 = vpack.c.bf16 %v276_v8, %v275_v7  ;;  %s461_s13 = sshll.u32 %s271_s12, 4  ;;  %s1201_s10 = scalar_lea.hbm %s1284_s3, %s611_s23  ;;  %s1210_s13 = int_to_ptr.vmem [resolvable:$true] %s461_s13 }
  0x72   : > { %649 = vmatpush3.bf16.msra.mxu0 %v648_v5  ;;  %v657_v13 = vpack.c.bf16 %v355_v11, %v354_v10  ;;  %v272_v14 = vld [vmem:[%s234_s21] sm:$0xff]  ;;  %s1208_s24 = scalar_lea.hbm %s1285_s4, %s611_s23  ;;  %s428_s18 = scalar_lea.sflag [#allocation4], %s1178_s28 }
  0x73   : > { %655 = vmatpush3.bf16.msra.mxu1 %v654_v9  ;;  %650 = vmatprep.subr.bf16.mxu0 %v963_v0  ;;  %s838_s7 = scalar_lea.vmem %s1203_s27, 128  ;;  %p1300_p12 = scmp.ne.s32.totalorder %s1296_s30, 0 }
  0x74   : > { %656 = vmatprep.subr.bf16.mxu1 %v963_v0  ;;  %p839_p8 = scmp.ne.s32.totalorder %s1203_s27, %s838_s7  ;;  %s966_s8 = smov [#allocation8]  }
  0x75   : > { %s842_s6 = sshll.u32 %s966_s8, 4  ;;  %s843_s6 = int_to_ptr.vmem [resolvable:$false] %s842_s6 }
  0x76   : > { %652 = vmatpush3.bf16.msra.mxu0 %v651_v12  ;;  %p840_p1 = pnand %p839_p8, %p1300_p12  ;;  %s844_s21 = scalar_lea.vmem %s843_s6, 256 }
  0x77   : > { %658 = vmatpush3.bf16.msra.mxu1 %v657_v13  ;;  %p845_p3 = scmp.lt.s32.totalorder %s1203_s27, %s843_s6  ;;  %p846_p5 = scmp.lt.s32.totalorder %s844_s21, %s838_s7 }
  0x78   : > { %p841_p10 = pneg %p840_p1 }
  0x79   : > { %634 = vmatmul.mubr.msk.f32.vlgmr.msra.gmra.mrb[0].mxu0 %vm277_vm1, %v272_v14  ;;  %p847_p9 = por %p846_p5, %p845_p3 }
  0x7a   : > { %645 = vmatmul.mubr.msk.f32.vlgmr.msra.gmra.mrb[0].mxu1 %vm277_vm1, %v272_v14 }
  0x7b   : > { %p848_p11 = pnand %p847_p9, %p841_p10 }
 0x14c   : > { %v347_v15 = vpop.f32.mrb[0].mxu0 }
 0x14d   : > { %351 = vst.msk [vmem:[%s264_s25] sm:$0xff] %vm277_vm1, %v347_v15  ;;  %v422_v16 = vpop.f32.mrb[0].mxu1  ;;  %v635_v17 = vpop.f32.mrb[1].mxu0 }
 0x14e   : > { %426 = vst.msk [vmem:[%s271_s12] sm:$0xff] %vm277_vm1, %v422_v16  ;;  %v646_v18 = vpop.f32.mrb[1].mxu1 }
 0x14f   : > { %851 = shalt.err (!%p848_p11)
}
 0x150   : > { %s852_s23 = scalar_lea.hbm %s1201_s10, 128  ;;  %s856_s29 = scalar_lea.hbm %s1284_s3, 256 }
 0x151   : > { %p853_p0 = scmp.ne.s32.totalorder %s1201_s10, %s852_s23  ;;  %p857_p6 = scmp.lt.u32.totalorder %s1201_s10, %s1284_s3 }
 0x152   : > { %p858_p7 = scmp.lt.u32.totalorder %s856_s29, %s852_s23  ;;  %p860_p8 = scmp.lt.u32.totalorder %s852_s23, %s1201_s10 }
 0x153   : > { %p854_p4 = pnand %p853_p0, %p1300_p12 }
 0x154   : > { %p859_p2 = por %p858_p7, %p857_p6 }
 0x155   : > { %p855_p13 = pneg %p854_p4 }
 0x156   : > { %p861_p1 = por %p860_p8, %p859_p2 }
 0x158   : > { %p862_p10 = pnand %p861_p1, %p855_p13 }
 0x15a   : > { %865 = shalt.err (!%p862_p10)
}
 0x15b   : > { %669 = dma.vmem_to_hbm [thread:$0]  (%p1300_p12), %s1203_s27, 128, %s1201_s10, %s428_s18  }
 0x15c   : > { %s433_s11 = scalar_lea.sflag [#allocation10], %s1178_s28  ;;  %s866_s7 = scalar_lea.vmem %s1210_s13, 128 }
 0x15d   : > { %p867_p3 = scmp.ne.s32.totalorder %s1210_s13, %s866_s7  ;;  %s967_s8 = smov [#allocation9]  }
 0x15e   : > { %s870_s6 = sshll.u32 %s967_s8, 4  ;;  %s871_s6 = int_to_ptr.vmem [resolvable:$false] %s870_s6 }
 0x15f   : > { %p868_p5 = pnand %p867_p3, %p1300_p12  ;;  %s872_s21 = scalar_lea.vmem %s871_s6, 256 }
 0x160   : > { %p873_p11 = scmp.lt.s32.totalorder %s1210_s13, %s871_s6  ;;  %p874_p0 = scmp.lt.s32.totalorder %s872_s21, %s866_s7 }
 0x161   : > { %p869_p9 = pneg %p868_p5 }
 0x162   : > { %p875_p4 = por %p874_p0, %p873_p11 }
 0x164   : > { %p876_p13 = pnand %p875_p4, %p869_p9 }
 0x166   : > { %879 = shalt.err (!%p876_p13)
}
 0x167   : > { %s880_s28 = scalar_lea.hbm %s1208_s24, 128  ;;  %s884_s18 = scalar_lea.hbm %s1285_s4, 256 }
 0x168   : > { %p881_p6 = scmp.ne.s32.totalorder %s1208_s24, %s880_s28  ;;  %p885_p8 = scmp.lt.u32.totalorder %s1208_s24, %s1285_s4 }
 0x169   : > { %p886_p1 = scmp.lt.u32.totalorder %s884_s18, %s880_s28  ;;  %p888_p3 = scmp.lt.u32.totalorder %s880_s28, %s1208_s24 }
 0x16a   : > { %p882_p7 = pnand %p881_p6, %p1300_p12 }
 0x16b   : > { %p887_p10 = por %p886_p1, %p885_p8 }
 0x16c   : > { %p883_p2 = pneg %p882_p7 }
 0x16d   : > { %p889_p5 = por %p888_p3, %p887_p10 }
 0x16f   : > { %p890_p9 = pnand %p889_p5, %p883_p2 }
 0x171   : > { %893 = shalt.err (!%p890_p9)
}
 0x172   : > { %670 = dma.vmem_to_hbm [thread:$0]  (%p1300_p12), %s1210_s13, 128, %s1208_s24, %s433_s11  }
 0x173 PF: > { %s473_s12 = sand.u32 1, %s936_s15   ;;  %p1301_p11 = scmp.ne.s32.totalorder %s1293_s26, 0 }
 0x174   : > { %p1302_p0 = scmp.ge.s32.totalorder %s956_s20, 2  ;;  %s474_s29 = scalar_lea.sflag [#allocation4], %s473_s12 }
 0x176   : > { %p685_p4 = pnand %p1302_p0, %p1301_p11 }
 0x178   : > { %927 = dma.done.wait (!%p685_p4), %s474_s29, 128  }
 0x179   : > { %929 = vsyncadd (!%p685_p4), %s474_s29, 4294967168  ;;  %s483_s14 = scalar_lea.sflag [#allocation10], %s473_s12 }
 0x17a   : > { %931 = dma.done.wait (!%p685_p4), %s483_s14, 128  }
 0x17b   : > { %933 = vsyncadd (!%p685_p4), %s483_s14, 4294967168  ;;  %s25_s20 = sadd.s32 1, %s956_s20   ;;  %s1303_s15 = smov %s940_s16 }
 0x17c   : > { %p22_p13 = scmp.ge.s32.totalorder %s25_s20, 4   ;;  %s1304_s16 = smov %s944_s17 }
 0x17d   : > { %s1305_s17 = smov %s1135_s22  ;;  %s1306_s18 = smov %s952_s19 }
 0x17e   : > { %s1307_s19 = smov %s1309_s5  ;;  %24 = sbr.rel (!%p22_p13) target bundleno = 9 (0x9), region = 102 }
 0x185   :  { %488 = vsyncpa [#allocation3], 1 }
 0x186   :  { %490 = vsyncpa [#allocation3 + $0x1], 1 }
 0x187   :  { %491 = vsyncpa [#allocation6], 1 }
 0x188   :  { %492 = vsyncpa [#allocation4], 1 }
 0x189   :  { %494 = vsyncpa [#allocation4 + $0x1], 1 }
 0x18a   :  { %495 = vsyncpa [#allocation10], 1 }
 0x18b   :  { %497 = vsyncpa [#allocation10 + $0x1], 1 }

</bundles_post_ra>
